<compile_context>
chip_gen: v5e
topology: v5e:2x2
jax: 0.10.0
libtpu: 0.0.40
codegen_flags: <defaults>
</compile_context>

<pallas_src>
import functools

import jax
import jax.numpy as jnp
from jax import lax
from jax.experimental import pallas as pl
from jax.experimental.pallas import tpu as pltpu


def _round_up(x, m):
    return ((x + m - 1) // m) * m


def _cdiv(a, b):
    return -(-a // b)


def _diff_loss_kernel(s_ref, t_ref, o_ref, gs_ref, gt_ref, *,
                      n_tiles, m_tiles, n_rows, m_rows, tr_s, tr_t,
                      mask_s, mask_t, inv_scale):
    i = pl.program_id(0)

    @pl.when(i == 0)
    def _():
        gs_ref[...] = jnp.zeros_like(gs_ref)
        gt_ref[...] = jnp.zeros_like(gt_ref)

    # tile.T @ tile, expressed by contracting the row (sublane) axis of both
    # operands -> no explicit `.T` / XLU transpose per step.
    dims = (((0,), (0,)), ((), ()))

    @pl.when(i < n_tiles)
    def _():
        s = s_ref[...]
        if mask_s:  # trace-time flag: only emitted when N is not tile-aligned
            rows = lax.broadcasted_iota(jnp.int32, s.shape, 0) + i * tr_s
            s = jnp.where(rows < n_rows, s, jnp.zeros_like(s))
        gs_ref[...] += lax.dot_general(
            s, s, dimension_numbers=dims,
            preferred_element_type=jnp.float32,
            precision=lax.Precision.HIGHEST)

    @pl.when(i < m_tiles)
    def _():
        t = t_ref[...]
        if mask_t:
            rows = lax.broadcasted_iota(jnp.int32, t.shape, 0) + i * tr_t
            t = jnp.where(rows < m_rows, t, jnp.zeros_like(t))
        gt_ref[...] += lax.dot_general(
            t, t, dimension_numbers=dims,
            preferred_element_type=jnp.float32,
            precision=lax.Precision.HIGHEST)

    @pl.when(i == pl.num_programs(0) - 1)
    def _():
        sumsq = jnp.sum(gs_ref[...] * gt_ref[...])   # single final XLU reduce
        o_ref[...] = jnp.sqrt(sumsq) * jnp.full((1, 1), inv_scale, jnp.float32)


def diff_loss(S, T, *, target_tile_bytes=4 << 20):
    """Frobenius norm of S @ T.T divided by (N * M), via Gram matrices."""
    N, D = S.shape
    M, Dt = T.shape
    assert D == Dt, "inner dims must match"

    if N == 0 or M == 0 or D == 0:
        # Empty product -> Frobenius norm 0; match PyTorch's division by N*M
        # (nan when the denominator is zero).
        return jnp.float32(0.0) / jnp.float32(N * M)

    # Lane-pad the feature dim only when it is not already 128-aligned
    # (zero columns contribute exactly zero to both Gram matrices).
    if D % 128 == 0:
        D_pad, S_in, T_in = D, S, T
    else:
        D_pad = _round_up(D, 128)
        S_in = jnp.pad(S, ((0, 0), (0, D_pad - D)))
        T_in = jnp.pad(T, ((0, 0), (0, D_pad - D)))

    s_item = jnp.dtype(S_in.dtype).itemsize
    t_item = jnp.dtype(T_in.dtype).itemsize

    # Row tile sized so each active tile is ~target_tile_bytes (>= 512 rows):
    # per-step DMA time well above the ~0.35us fixed pipeline overhead.
    tile_rows = max(512, target_tile_bytes // (max(s_item, t_item) * D_pad))
    tile_rows = _round_up(int(tile_rows), 8)
    tr_s = min(tile_rows, _round_up(N, 8))
    tr_t = min(tile_rows, _round_up(M, 8))

    # Generation-aware VMEM budget (v5e/v6e: 128 MiB, v7x: 64 MiB per core).
    try:
        vmem_cap = int(pltpu.get_tpu_info().vmem_capacity_bytes)
    except Exception:  # conservative fallback: smallest current generation
        vmem_cap = 64 << 20
    vmem_budget = max(int(0.75 * vmem_cap), 32 << 20)

    def vmem_estimate(trs, trt):
        # two double-buffered input tiles + two f32 Gram accumulators
        return (2 * trs * D_pad * s_item + 2 * trt * D_pad * t_item
                + 2 * D_pad * D_pad * 4)

    while vmem_estimate(tr_s, tr_t) > vmem_budget and max(tr_s, tr_t) > 8:
        tr_s = max(8, _round_up(tr_s // 2, 8))
        tr_t = max(8, _round_up(tr_t // 2, 8))
    # TODO(synk): tile the D axis of the Gram accumulators when
    # 2 * D_pad^2 * 4 bytes alone approaches the VMEM budget (large D on v7x).
    # TODO(synk): on v7x add a leading "parallel" grid axis so the second
    # TensorCore streams the other operand (per-core partial Grams combined in
    # the wrapper) for ~2x on the memory-bound stream.

    n_tiles = _cdiv(N, tr_s)
    m_tiles = _cdiv(M, tr_t)
    grid = (max(n_tiles, m_tiles),)

    kernel = functools.partial(
        _diff_loss_kernel,
        n_tiles=n_tiles, m_tiles=m_tiles,
        n_rows=N, m_rows=M,
        tr_s=tr_s, tr_t=tr_t,
        mask_s=(N % tr_s != 0), mask_t=(M % tr_t != 0),
        inv_scale=1.0 / float(N * M))

    # Clamped index maps: once a stream runs out of tiles its block index stays
    # constant, so Pallas skips the redundant DMA on those steps.
    out = pl.pallas_call(
        kernel,
        out_shape=jax.ShapeDtypeStruct((1, 1), jnp.float32),
        grid_spec=pltpu.PrefetchScalarGridSpec(
            num_scalar_prefetch=0,
            grid=grid,
            in_specs=[
                pl.BlockSpec((tr_s, D_pad),
                             lambda i: (jnp.minimum(i, n_tiles - 1), 0)),
                pl.BlockSpec((tr_t, D_pad),
                             lambda i: (jnp.minimum(i, m_tiles - 1), 0)),
            ],
            out_specs=pl.BlockSpec((1, 1), lambda i: (0, 0)),
            scratch_shapes=[
                pltpu.VMEM((D_pad, D_pad), jnp.float32),  # S.T @ S accumulator
                pltpu.VMEM((D_pad, D_pad), jnp.float32),  # T.T @ T accumulator
            ],
        ),
        compiler_params=pltpu.CompilerParams(
            dimension_semantics=("arbitrary",),  # sequential accumulation
            vmem_limit_bytes=int(vmem_budget),
        ),
    )(S_in, T_in)
    return out[0, 0]


def diff_loss_ref(S, T):
    Sf = S.astype(jnp.float32)
    Tf = T.astype(jnp.float32)
    res = jnp.matmul(Sf, Tf.T, precision="highest")
    return jnp.sqrt(jnp.sum(res * res)) / (S.shape[0] * T.shape[0])


if __name__ == "__main__":
    key = jax.random.PRNGKey(0)
    k_s, k_t = jax.random.split(key)

    # Small shapes consistent with the module: S (N, D), T (M, D).
    N, M, D = 8, 16, 32
    S = jax.random.normal(k_s, (N, D), dtype=jnp.float32)
    T = jax.random.normal(k_t, (M, D), dtype=jnp.float32)
    out = jax.block_until_ready(diff_loss(S, T))
    ref = diff_loss_ref(S, T)
    assert jnp.allclose(out, ref, rtol=1e-4, atol=1e-6), (out, ref)

    # Unaligned rows + lanes exercise the in-kernel row masking and lane pad.
    N2, M2, D2 = 13, 21, 40
    S2 = jax.random.normal(k_s, (N2, D2), dtype=jnp.float32)
    T2 = jax.random.normal(k_t, (M2, D2), dtype=jnp.float32)
    out2 = jax.block_until_ready(diff_loss(S2, T2))
    ref2 = diff_loss_ref(S2, T2)
    assert jnp.allclose(out2, ref2, rtol=1e-4, atol=1e-6), (out2, ref2)

    # bf16 inputs are streamed natively (no f32 upcast pass through HBM).
    S3 = S2.astype(jnp.bfloat16)
    T3 = T2.astype(jnp.bfloat16)
    out3 = jax.block_until_ready(diff_loss(S3, T3))
    ref3 = diff_loss_ref(S3, T3)
    assert jnp.allclose(out3, ref3, rtol=2e-2, atol=1e-5), (out3, ref3)

    print("KERNEL_OK")
</pallas_src>

<mosaic_0001>
module attributes {stable_mosaic.version = 11 : i64} {
  func.func @_diff_loss_kernel(%arg0: i32, %arg1: memref<8x128xf32, #tpu.memory_space<vmem>>, %arg2: memref<16x128xf32, #tpu.memory_space<vmem>>, %arg3: memref<1x1xf32, #tpu.memory_space<vmem>>, %arg4: memref<128x128xf32, #tpu.memory_space<vmem>>, %arg5: memref<128x128xf32, #tpu.memory_space<vmem>>) attributes {dimension_semantics = [#tpu.dimension_semantics<arbitrary>], iteration_bounds = array<i64: 1>, scalar_prefetch = 0 : i64, scratch_operands = 2 : i64, tpu.core_type = #tpu.core_type<tc>, window_params = [{transform_indices = @transform_0, window_bounds = array<i64: 8, 128>}, {transform_indices = @transform_1, window_bounds = array<i64: 16, 128>}, {pipeline_mode = #tpu.pipeline_mode<synchronous>, transform_indices = @transform_2, window_bounds = array<i64: 1, 1>}]} {
    %c0_i32 = arith.constant 0 : i32
    %0 = arith.cmpi eq, %arg0, %c0_i32 : i32
    %1 = arith.extui %0 : i1 to i32
    %c0_i32_0 = arith.constant 0 : i32
    %2 = arith.cmpi ne, %1, %c0_i32_0 : i32
    scf.if %2 {
      %cst = arith.constant 0.000000e+00 : f32
      %12 = vector.broadcast %cst : f32 to vector<128x128xf32>
      %c0 = arith.constant 0 : index
      %c0_6 = arith.constant 0 : index
      %13 = vector.load %arg4[%c0, %c0_6] : memref<128x128xf32, #tpu.memory_space<vmem>>, vector<128x128xf32>
      tpu.vector_store %arg4[%c0, %c0_6], %12 {strides = array<i32>} : memref<128x128xf32, #tpu.memory_space<vmem>>, vector<128x128xf32>,
      %cst_7 = arith.constant 0.000000e+00 : f32
      %14 = vector.broadcast %cst_7 : f32 to vector<128x128xf32>
      %c0_8 = arith.constant 0 : index
      %c0_9 = arith.constant 0 : index
      %15 = vector.load %arg5[%c0_8, %c0_9] : memref<128x128xf32, #tpu.memory_space<vmem>>, vector<128x128xf32>
      tpu.vector_store %arg5[%c0_8, %c0_9], %14 {strides = array<i32>} : memref<128x128xf32, #tpu.memory_space<vmem>>, vector<128x128xf32>,
    } else {
    }
    %c1_i32 = arith.constant 1 : i32
    %3 = arith.cmpi slt, %arg0, %c1_i32 : i32
    %4 = arith.extui %3 : i1 to i32
    %c0_i32_1 = arith.constant 0 : i32
    %5 = arith.cmpi ne, %4, %c0_i32_1 : i32
    scf.if %5 {
      %c0 = arith.constant 0 : index
      %c0_6 = arith.constant 0 : index
      %12 = vector.load %arg1[%c0, %c0_6] : memref<8x128xf32, #tpu.memory_space<vmem>>, vector<8x128xf32>
      %c0_7 = arith.constant 0 : index
      %c0_8 = arith.constant 0 : index
      %13 = vector.load %arg4[%c0_7, %c0_8] : memref<128x128xf32, #tpu.memory_space<vmem>>, vector<128x128xf32>
      %cst = arith.constant dense<0.000000e+00> : vector<128x128xf32>
      %14 = tpu.matmul %12, %12, %cst {dimension_numbers = #tpu.dot_dimension_numbers<[0], [0], [1], [1], [0, 1, 1, 1], [], []>, precision = #tpu.contract_precision<fp32>} : vector<8x128xf32>, vector<8x128xf32>, vector<128x128xf32> -> vector<128x128xf32>
      %15 = arith.addf %13, %14 : vector<128x128xf32>
      %c0_9 = arith.constant 0 : index
      %c0_10 = arith.constant 0 : index
      %16 = vector.load %arg4[%c0_9, %c0_10] : memref<128x128xf32, #tpu.memory_space<vmem>>, vector<128x128xf32>
      tpu.vector_store %arg4[%c0_9, %c0_10], %15 {strides = array<i32>} : memref<128x128xf32, #tpu.memory_space<vmem>>, vector<128x128xf32>,
    } else {
    }
    %c1_i32_2 = arith.constant 1 : i32
    %6 = arith.cmpi slt, %arg0, %c1_i32_2 : i32
    %7 = arith.extui %6 : i1 to i32
    %c0_i32_3 = arith.constant 0 : i32
    %8 = arith.cmpi ne, %7, %c0_i32_3 : i32
    scf.if %8 {
      %c0 = arith.constant 0 : index
      %c0_6 = arith.constant 0 : index
      %12 = vector.load %arg2[%c0, %c0_6] : memref<16x128xf32, #tpu.memory_space<vmem>>, vector<16x128xf32>
      %c0_7 = arith.constant 0 : index
      %c0_8 = arith.constant 0 : index
      %13 = vector.load %arg5[%c0_7, %c0_8] : memref<128x128xf32, #tpu.memory_space<vmem>>, vector<128x128xf32>
      %cst = arith.constant dense<0.000000e+00> : vector<128x128xf32>
      %14 = tpu.matmul %12, %12, %cst {dimension_numbers = #tpu.dot_dimension_numbers<[0], [0], [1], [1], [0, 1, 1, 1], [], []>, precision = #tpu.contract_precision<fp32>} : vector<16x128xf32>, vector<16x128xf32>, vector<128x128xf32> -> vector<128x128xf32>
      %15 = arith.addf %13, %14 : vector<128x128xf32>
      %c0_9 = arith.constant 0 : index
      %c0_10 = arith.constant 0 : index
      %16 = vector.load %arg5[%c0_9, %c0_10] : memref<128x128xf32, #tpu.memory_space<vmem>>, vector<128x128xf32>
      tpu.vector_store %arg5[%c0_9, %c0_10], %15 {strides = array<i32>} : memref<128x128xf32, #tpu.memory_space<vmem>>, vector<128x128xf32>,
    } else {
    }
    %c0_i32_4 = arith.constant 0 : i32
    %9 = arith.cmpi eq, %arg0, %c0_i32_4 : i32
    %10 = arith.extui %9 : i1 to i32
    %c0_i32_5 = arith.constant 0 : i32
    %11 = arith.cmpi ne, %10, %c0_i32_5 : i32
    scf.if %11 {
      %c0 = arith.constant 0 : index
      %c0_6 = arith.constant 0 : index
      %12 = vector.load %arg4[%c0, %c0_6] : memref<128x128xf32, #tpu.memory_space<vmem>>, vector<128x128xf32>
      %c0_7 = arith.constant 0 : index
      %c0_8 = arith.constant 0 : index
      %13 = vector.load %arg5[%c0_7, %c0_8] : memref<128x128xf32, #tpu.memory_space<vmem>>, vector<128x128xf32>
      %14 = arith.mulf %12, %13 : vector<128x128xf32>
      %15 = vector.shape_cast %14 : vector<128x128xf32> to vector<1x128x128xf32>
      %cst = arith.constant dense<0.000000e+00> : vector<1xf32>
      %16 = vector.multi_reduction <add>, %15, %cst [1, 2] : vector<1x128x128xf32> to vector<1xf32>
      %17 = vector.shape_cast %16 : vector<1xf32> to vector<1x1x1xf32>
      %18 = vector.extract %17[0, 0, 0] : f32 from vector<1x1x1xf32>
      %19 = math.sqrt %18 : f32
      %cst_9 = arith.constant 7.812500e-03 : f32
      %20 = vector.broadcast %cst_9 : f32 to vector<1x1xf32>
      %21 = vector.broadcast %19 : f32 to vector<1x1xf32>
      %22 = arith.mulf %21, %20 : vector<1x1xf32>
      %c0_10 = arith.constant 0 : index
      %c0_11 = arith.constant 0 : index
      %23 = vector.load %arg3[%c0_10, %c0_11] : memref<1x1xf32, #tpu.memory_space<vmem>>, vector<1x1xf32>
      tpu.vector_store %arg3[%c0_10, %c0_11], %22 {strides = array<i32>} : memref<1x1xf32, #tpu.memory_space<vmem>>, vector<1x1xf32>,
    } else {
    }
    return
  }
  func.func @transform_0(%arg0: i32) -> (i32, i32) {
    %c0_i32 = arith.constant 0 : i32
    %0 = arith.minsi %arg0, %c0_i32 : i32
    %c0_i32_0 = arith.constant 0 : i32
    %c0_i32_1 = arith.constant 0 : i32
    return %0, %c0_i32_0 : i32, i32
  }
  func.func @transform_1(%arg0: i32) -> (i32, i32) {
    %c0_i32 = arith.constant 0 : i32
    %0 = arith.minsi %arg0, %c0_i32 : i32
    %c0_i32_0 = arith.constant 0 : i32
    %c0_i32_1 = arith.constant 0 : i32
    return %0, %c0_i32_0 : i32, i32
  }
  func.func @transform_2(%arg0: i32) -> (i32, i32) {
    %c0_i32 = arith.constant 0 : i32
    %c0_i32_0 = arith.constant 0 : i32
    %c0_i32_1 = arith.constant 0 : i32
    return %c0_i32, %c0_i32_0 : i32, i32
  }
}

</mosaic_0001>

<bundles_post_ra>
// kernel: tpu_custom_call.1
= control target key start
LH: loop header
LB: loop body
LE: loop exit
PB: predicated region body
PF: predicated region fallthrough
CT: control target
= control target key end

     0   :  { %7 = vsyncpa [#allocation5], 0  ;;  %s2332_s0 = inlined_call_operand.hbm [shape: f32[8,128], index: 0, kind: input, shape index: {}]   ;;  %s2333_s1 = inlined_call_operand.hbm [shape: f32[16,128], index: 1, kind: input, shape index: {}]   ;;  %s2334_s2 = inlined_call_operand.hbm [shape: f32[1,1], index: 2, kind: output, shape index: {}]  }
   0x1   :  { %8 = vsyncpa [#allocation8], 0 }
   0x2   :  { %9 = vsyncpa [#allocation6], 0  ;;  %s15_s11 = sshll.u32 %s2332_s0, 4  ;;  %s1779_s12 = smov [#allocation4]   ;;  %s16_s11 = int_to_ptr.hbm [resolvable:$true] %s15_s11 }
   0x3   :  { %s17_s13 = sshll.u32 %s1779_s12, 4  ;;  %s25_s16 = sshll.u32 %s2333_s1, 4  ;;  %s18_s13 = int_to_ptr.vmem [resolvable:$true] %s17_s13  ;;  %s26_s16 = int_to_ptr.hbm [resolvable:$true] %s25_s16 }
   0x4   :  { %20 = dma.hbm_to_vmem [thread:$0]  %s16_s11, 128, %s18_s13, [#allocation5]  }
   0x5   :  { %s1780_s17 = smov [#allocation7]   ;;  %s1781_s19 = smov 128  }
   0x6   :  { %s27_s18 = sshll.u32 %s1780_s17, 4  ;;  %s1782_s20 = smov 8   ;;  %s28_s18 = int_to_ptr.vmem [resolvable:$true] %s27_s18 }
   0x7   :  { %33 = dma.hbm_to_vmem [thread:$0]  %s26_s16, 256, %s28_s18, [#allocation8], %s1781_s19, %s1781_s19, %s1782_s20  }
   0x8   :  { %1773 = dma.done.wait [#allocation5], 128  }
   0x9   :  { %1774 = vsyncadd [#allocation5], 4294967168 }
   0xa   :  { %1775 = dma.done.wait [#allocation8], 256  }
   0xb   :  { %1776 = vsyncadd [#allocation8], 4294967040  ;;  %v82_v0 = vld [vmem:[#allocation4] sm:$0xff]  ;;  %v824_v3 = vld [vmem:[#allocation7 + $0x8] sm:$0xff]  ;;  %vm131_vm0 = vcmask 64512   ;;  %vm873_vm1 = vcmask 130048  }
   0xc   :  { %99 = vxpose.xlu0.b32.start.end [1/1] (short) %v82_v0, 128  ;;  %v195_v1 = vand.u32 4294901760, %v82_v0  ;;  %v1805_v4 = vand.u32 4294901760, %v824_v3  ;;  %v823_v5 = vld [vmem:[#allocation7] sm:$0xff]  ;;  %s1783_s1 = smov [#allocation9]   ;;  %s1678_s24 = sshll.u32 %s2334_s2, 4  ;;  %vm1669_vm4 = vcmask 0   ;;  %s1679_s24 = int_to_ptr.hbm [resolvable:$true] %s1678_s24 }
   0xd   :  { %v1807_v6 = vand.u32 4294901760, %v823_v5  ;;  %s1676_s21 = sshll.u32 %s1783_s1, 4  ;;  %s1677_s21 = int_to_ptr.vmem [resolvable:$true] %s1676_s21 }
   0xe   :  { %v342_v2 = vsub.f32 %v82_v0, %v195_v1  ;;  %527 = vmatpush.msra.mxu3 %v195_v1  ;;  %196 = vmatpush.msra.mxu0 %v195_v1  ;;  %v1084_v10 = vsub.f32 %v824_v3, %v1805_v4 }
   0xf   :  { %v1090_v25 = vsub.f32 %v823_v5, %v1807_v6 }
  0x10   :  { %429 = vmatpush.msra.mxu2 %v342_v2  ;;  %v343_v7 = vand.u32 4294901760, %v342_v2  ;;  %v1085_v11 = vand.u32 4294901760, %v1084_v10 }
  0x11   :  { %v1091_v55 = vand.u32 4294901760, %v1090_v25 }
  0x12   :  { %937 = vmatpush.msrb.mxu2 %v1805_v4  ;;  %v344_v8 = vsub.f32 %v342_v2, %v343_v7  ;;  %643 = vmatpush.msrb.mxu0 %v343_v7  ;;  %v1086_v12 = vsub.f32 %v1084_v10, %v1085_v11 }
  0x13   :  { %v1092_v58 = vsub.f32 %v1090_v25, %v1091_v55 }
  0x14   :  { %939 = vmatpush.msrb.mxu2 %v1807_v6  ;;  %v345_v9 = vand.u32 4294901760, %v344_v8  ;;  %v1087_v13 = vand.u32 4294901760, %v1086_v12 }
  0x15   :  { %v1093_v62 = vand.u32 4294901760, %v1092_v58 }
  0x16   :  { %346 = vmatpush.msra.mxu1 %v345_v9  ;;  %1088 = vmatpush.msrb.mxu3 %v1087_v13 }
  0x18   :  { %725 = vmatpush.msrb.mxu1 %v195_v1  ;;  %1094 = vmatpush.msrb.mxu3 %v1093_v62 }
  0x8c   :  { %841 = vxpose.xlu0.b32.start [1/2] (short) %v823_v5, 128 }
  0x94   :  { %842 = vxpose.xlu0.b32.end [2/2] (short) %v824_v3, 128 }
  0xb0   :  { %v115_v14 = vpop.trf.xlu0 }
  0xb1   :  { %v133_v15 = vsel %vm131_vm0, %v115_v14, 0 }
  0xb2   :  { %v1813_v16 = vand.u32 4294901760, %v133_v15 }
  0xb4   :  { %v198_v17 = vsub.f32 %v133_v15, %v1813_v16  ;;  %348 = vmatmul.f32.vlgmr.msra.gmra.mxu1 %v1813_v16 }
  0xb5   :  { %1276 = vmatpush.msra.mxu1 %v1805_v4 }
  0xb6   :  { %432 = vmatmul.f32.vlgmr.msra.gmra.mxu2 %v198_v17  ;;  %v199_v18 = vand.u32 4294901760, %v198_v17 }
  0xb7   :  { %1393 = vmatpush.msra.mxu2 %v1085_v11  ;;  %1278 = vmatpush.msra.mxu1 %v1807_v6 }
  0xb8   :  { %v116_v19 = vpop.trf.xlu0  ;;  %531 = vmatmul.f32.vlgmr.msra.gmra.mxu3 %v199_v18  ;;  %v200_v20 = vsub.f32 %v198_v17, %v199_v18 }
  0xb9   :  { %v136_v21 = vsel %vm131_vm0, %v116_v19, 0  ;;  %1397 = vmatpush.msra.mxu2 %v1091_v55  ;;  %1478 = vmatpush.msra.mxu3 %v1805_v4 }
  0xba   :  { %v1820_v22 = vand.u32 4294901760, %v136_v21  ;;  %v201_v23 = vand.u32 4294901760, %v200_v20 }
  0xbb   :  { %1480 = vmatpush.msra.mxu3 %v1807_v6 }
  0xbc   :  { %v206_v24 = vsub.f32 %v136_v21, %v1820_v22  ;;  %202 = vmatmul.f32.vlgmr.msra.gmra.mxu0 %v201_v23  ;;  %352 = vmatmul.f32.gmra.mxu1 %v1820_v22 }
  0xbd   :  { %1176 = vmatpush.msra.mxu0 %v1084_v10 }
  0xbe   :  { %437 = vmatmul.f32.gmra.mxu2 %v206_v24  ;;  %v207_v26 = vand.u32 4294901760, %v206_v24 }
  0xbf   :  { %1179 = vmatpush.msra.mxu0 %v1090_v25 }
  0xc0   :  { %v117_v27 = vpop.trf.xlu0  ;;  %537 = vmatmul.f32.gmra.mxu3 %v207_v26  ;;  %v208_v28 = vsub.f32 %v206_v24, %v207_v26 }
  0xc1   :  { %v139_v29 = vsel %vm131_vm0, %v117_v27, 0 }
  0xc2   :  { %v1826_v30 = vand.u32 4294901760, %v139_v29  ;;  %v209_v31 = vand.u32 4294901760, %v208_v28 }
  0xc4   :  { %v214_v32 = vsub.f32 %v139_v29, %v1826_v30  ;;  %210 = vmatmul.f32.gmra.mxu0 %v209_v31  ;;  %356 = vmatmul.f32.gmra.mxu1 %v1826_v30 }
  0xc6   :  { %442 = vmatmul.f32.gmra.mxu2 %v214_v32  ;;  %v215_v33 = vand.u32 4294901760, %v214_v32 }
  0xc8   :  { %v118_v34 = vpop.trf.xlu0  ;;  %543 = vmatmul.f32.gmra.mxu3 %v215_v33  ;;  %v216_v35 = vsub.f32 %v214_v32, %v215_v33 }
  0xc9   :  { %v142_v36 = vsel %vm131_vm0, %v118_v34, 0 }
  0xca   :  { %v1831_v37 = vand.u32 4294901760, %v142_v36  ;;  %v217_v38 = vand.u32 4294901760, %v216_v35 }
  0xcc   :  { %v222_v39 = vsub.f32 %v142_v36, %v1831_v37  ;;  %218 = vmatmul.f32.gmra.mxu0 %v217_v38  ;;  %360 = vmatmul.f32.gmra.mxu1 %v1831_v37 }
  0xce   :  { %447 = vmatmul.f32.gmra.mxu2 %v222_v39  ;;  %v223_v40 = vand.u32 4294901760, %v222_v39 }
  0xd0   :  { %v119_v41 = vpop.trf.xlu0  ;;  %549 = vmatmul.f32.gmra.mxu3 %v223_v40  ;;  %v224_v42 = vsub.f32 %v222_v39, %v223_v40 }
  0xd1   :  { %v145_v43 = vsel %vm131_vm0, %v119_v41, 0 }
  0xd2   :  { %v1836_v44 = vand.u32 4294901760, %v145_v43  ;;  %v225_v45 = vand.u32 4294901760, %v224_v42 }
  0xd4   :  { %v230_v46 = vsub.f32 %v145_v43, %v1836_v44  ;;  %226 = vmatmul.f32.gmra.mxu0 %v225_v45  ;;  %364 = vmatmul.f32.gmra.mxu1 %v1836_v44 }
  0xd6   :  { %452 = vmatmul.f32.gmra.mxu2 %v230_v46  ;;  %v231_v47 = vand.u32 4294901760, %v230_v46 }
  0xd8   :  { %v120_v48 = vpop.trf.xlu0  ;;  %555 = vmatmul.f32.gmra.mxu3 %v231_v47  ;;  %v232_v49 = vsub.f32 %v230_v46, %v231_v47 }
  0xd9   :  { %v148_v50 = vsel %vm131_vm0, %v120_v48, 0 }
  0xda   :  { %v1841_v51 = vand.u32 4294901760, %v148_v50  ;;  %v233_v52 = vand.u32 4294901760, %v232_v49 }
  0xdc   :  { %v238_v53 = vsub.f32 %v148_v50, %v1841_v51  ;;  %234 = vmatmul.f32.gmra.mxu0 %v233_v52  ;;  %368 = vmatmul.f32.gmra.mxu1 %v1841_v51 }
  0xde   :  { %457 = vmatmul.f32.gmra.mxu2 %v238_v53  ;;  %v239_v54 = vand.u32 4294901760, %v238_v53 }
  0xe0   :  { %v121_v56 = vpop.trf.xlu0  ;;  %561 = vmatmul.f32.gmra.mxu3 %v239_v54  ;;  %v240_v57 = vsub.f32 %v238_v53, %v239_v54 }
  0xe1   :  { %v151_v59 = vsel %vm131_vm0, %v121_v56, 0 }
  0xe2   :  { %v1846_v60 = vand.u32 4294901760, %v151_v59  ;;  %v241_v61 = vand.u32 4294901760, %v240_v57 }
  0xe4   :  { %v246_v63 = vsub.f32 %v151_v59, %v1846_v60  ;;  %242 = vmatmul.f32.gmra.mxu0 %v241_v61  ;;  %372 = vmatmul.f32.gmra.mxu1 %v1846_v60 }
  0xe6   :  { %462 = vmatmul.f32.gmra.mxu2 %v246_v63  ;;  %v247_v0 = vand.u32 4294901760, %v246_v63 }
  0xe8   :  { %v122_v1 = vpop.trf.xlu0  ;;  %567 = vmatmul.f32.gmra.mxu3 %v247_v0  ;;  %v248_v2 = vsub.f32 %v246_v63, %v247_v0 }
  0xe9   :  { %v154_v3 = vsel %vm131_vm0, %v122_v1, 0 }
  0xea   :  { %v1853_v5 = vand.u32 4294901760, %v154_v3  ;;  %v249_v7 = vand.u32 4294901760, %v248_v2 }
  0xec   :  { %v254_v8 = vsub.f32 %v154_v3, %v1853_v5  ;;  %250 = vmatmul.f32.gmra.mxu0 %v249_v7  ;;  %376 = vmatmul.f32.gmra.mxu1 %v1853_v5 }
  0xee   :  { %467 = vmatmul.f32.gmra.mxu2 %v254_v8  ;;  %v255_v9 = vand.u32 4294901760, %v254_v8 }
  0xf0   :  { %v123_v10 = vpop.trf.xlu0  ;;  %573 = vmatmul.f32.gmra.mxu3 %v255_v9  ;;  %v256_v4 = vsub.f32 %v254_v8, %v255_v9 }
  0xf1   :  { %v157_v11 = vsel %vm131_vm0, %v123_v10, 0 }
  0xf2   :  { %v1858_v12 = vand.u32 4294901760, %v157_v11  ;;  %v257_v13 = vand.u32 4294901760, %v256_v4 }
  0xf4   :  { %v262_v6 = vsub.f32 %v157_v11, %v1858_v12  ;;  %258 = vmatmul.f32.gmra.mxu0 %v257_v13  ;;  %380 = vmatmul.f32.gmra.mxu1 %v1858_v12 }
  0xf6   :  { %472 = vmatmul.f32.gmra.mxu2 %v262_v6  ;;  %v263_v14 = vand.u32 4294901760, %v262_v6 }
  0xf8   :  { %v124_v15 = vpop.trf.xlu0  ;;  %579 = vmatmul.f32.gmra.mxu3 %v263_v14  ;;  %v264_v17 = vsub.f32 %v262_v6, %v263_v14 }
  0xf9   :  { %v160_v18 = vsel %vm131_vm0, %v124_v15, 0 }
  0xfa   :  { %v1863_v19 = vand.u32 4294901760, %v160_v18  ;;  %v265_v20 = vand.u32 4294901760, %v264_v17 }
  0xfc   :  { %v270_v21 = vsub.f32 %v160_v18, %v1863_v19  ;;  %266 = vmatmul.f32.gmra.mxu0 %v265_v20  ;;  %384 = vmatmul.f32.gmra.mxu1 %v1863_v19 }
  0xfe   :  { %477 = vmatmul.f32.gmra.mxu2 %v270_v21  ;;  %v271_v23 = vand.u32 4294901760, %v270_v21 }
 0x100   :  { %v125_v24 = vpop.trf.xlu0  ;;  %585 = vmatmul.f32.gmra.mxu3 %v271_v23  ;;  %v272_v25 = vsub.f32 %v270_v21, %v271_v23 }
 0x101   :  { %v163_v26 = vsel %vm131_vm0, %v125_v24, 0 }
 0x102   :  { %v1868_v27 = vand.u32 4294901760, %v163_v26  ;;  %v273_v28 = vand.u32 4294901760, %v272_v25 }
 0x104   :  { %v278_v29 = vsub.f32 %v163_v26, %v1868_v27  ;;  %274 = vmatmul.f32.gmra.mxu0 %v273_v28  ;;  %388 = vmatmul.f32.gmra.mxu1 %v1868_v27 }
 0x106   :  { %482 = vmatmul.f32.gmra.mxu2 %v278_v29  ;;  %v279_v31 = vand.u32 4294901760, %v278_v29 }
 0x108   :  { %v126_v32 = vpop.trf.xlu0  ;;  %591 = vmatmul.f32.gmra.mxu3 %v279_v31  ;;  %v280_v33 = vsub.f32 %v278_v29, %v279_v31 }
 0x109   :  { %v166_v34 = vsel %vm131_vm0, %v126_v32, 0 }
 0x10a   :  { %v1873_v35 = vand.u32 4294901760, %v166_v34  ;;  %v281_v36 = vand.u32 4294901760, %v280_v33 }
 0x10c   :  { %v286_v38 = vsub.f32 %v166_v34, %v1873_v35  ;;  %282 = vmatmul.f32.gmra.mxu0 %v281_v36  ;;  %392 = vmatmul.f32.gmra.mxu1 %v1873_v35 }
 0x10e   :  { %487 = vmatmul.f32.gmra.mxu2 %v286_v38  ;;  %v287_v39 = vand.u32 4294901760, %v286_v38 }
 0x110   :  { %v127_v40 = vpop.trf.xlu0  ;;  %597 = vmatmul.f32.gmra.mxu3 %v287_v39  ;;  %v288_v41 = vsub.f32 %v286_v38, %v287_v39 }
 0x111   :  { %v169_v42 = vsel %vm131_vm0, %v127_v40, 0 }
 0x112   :  { %v1878_v43 = vand.u32 4294901760, %v169_v42  ;;  %v289_v45 = vand.u32 4294901760, %v288_v41 }
 0x114   :  { %v294_v46 = vsub.f32 %v169_v42, %v1878_v43  ;;  %290 = vmatmul.f32.gmra.mxu0 %v289_v45  ;;  %396 = vmatmul.f32.gmra.mxu1 %v1878_v43 }
 0x116   :  { %492 = vmatmul.f32.gmra.mxu2 %v294_v46  ;;  %v295_v47 = vand.u32 4294901760, %v294_v46 }
 0x118   :  { %v128_v48 = vpop.trf.xlu0  ;;  %603 = vmatmul.f32.gmra.mxu3 %v295_v47  ;;  %v296_v49 = vsub.f32 %v294_v46, %v295_v47 }
 0x119   :  { %v172_v50 = vsel %vm131_vm0, %v128_v48, 0 }
 0x11a   :  { %v1883_v52 = vand.u32 4294901760, %v172_v50  ;;  %v297_v53 = vand.u32 4294901760, %v296_v49 }
 0x11c   :  { %v302_v54 = vsub.f32 %v172_v50, %v1883_v52  ;;  %298 = vmatmul.f32.gmra.mxu0 %v297_v53  ;;  %400 = vmatmul.f32.gmra.mxu1 %v1883_v52 }
 0x11e   :  { %497 = vmatmul.f32.gmra.mxu2 %v302_v54  ;;  %v303_v55 = vand.u32 4294901760, %v302_v54 }
 0x120   :  { %v129_v56 = vpop.trf.xlu0  ;;  %609 = vmatmul.f32.gmra.mxu3 %v303_v55  ;;  %v304_v57 = vsub.f32 %v302_v54, %v303_v55 }
 0x121   :  { %v175_v58 = vsel %vm131_vm0, %v129_v56, 0 }
 0x122   :  { %v1888_v59 = vand.u32 4294901760, %v175_v58  ;;  %v305_v61 = vand.u32 4294901760, %v304_v57 }
 0x124   :  { %v310_v62 = vsub.f32 %v175_v58, %v1888_v59  ;;  %306 = vmatmul.f32.gmra.mxu0 %v305_v61  ;;  %404 = vmatmul.f32.gmra.mxu1 %v1888_v59 }
 0x126   :  { %502 = vmatmul.f32.gmra.mxu2 %v310_v62  ;;  %v311_v63 = vand.u32 4294901760, %v310_v62 }
 0x128   :  { %v130_v0 = vpop.trf.xlu0  ;;  %615 = vmatmul.f32.gmra.mxu3 %v311_v63  ;;  %v312_v1 = vsub.f32 %v310_v62, %v311_v63 }
 0x129   :  { %v178_v2 = vsel %vm131_vm0, %v130_v0, 0 }
 0x12a   :  { %v1893_v3 = vand.u32 4294901760, %v178_v2  ;;  %v313_v7 = vand.u32 4294901760, %v312_v1 }
 0x12c   :  { %v318_v8 = vsub.f32 %v178_v2, %v1893_v3  ;;  %314 = vmatmul.f32.gmra.mxu0 %v313_v7  ;;  %408 = vmatmul.f32.gmra.mxu1 %v1893_v3 }
 0x12e   :  { %507 = vmatmul.f32.gmra.mxu2 %v318_v8  ;;  %v319_v9 = vand.u32 4294901760, %v318_v8 }
 0x130   :  { %v857_v10 = vpop.trf.xlu0  ;;  %621 = vmatmul.f32.gmra.mxu3 %v319_v9  ;;  %v320_v4 = vsub.f32 %v318_v8, %v319_v9 }
 0x131   :  { %v875_v11 = vsel %vm873_vm1, %v857_v10, 0  ;;  %v349_v13 = vpop.f32.mrf.mxu1 }
 0x132   :  { %v1898_v6 = vand.u32 4294901760, %v875_v11  ;;  %v321_v14 = vand.u32 4294901760, %v320_v4 }
 0x134   :  { %v1901_v15 = vsub.f32 %v875_v11, %v1898_v6  ;;  %322 = vmatmul.f32.gmra.mxu0 %v321_v14  ;;  %727 = vmatmul.f32.vlgmr.msrb.gmra.mxu1 %v1813_v16 }
 0x136   :  { %v942_v17 = vand.u32 4294901760, %v1901_v15 }
 0x138   :  { %v858_v18 = vpop.trf.xlu0  ;;  %1096 = vmatmul.f32.vlgmr.msrb.gmra.mxu3 %v1898_v6  ;;  %v943_v20 = vsub.f32 %v1901_v15, %v942_v17 }
 0x139   :  { %v878_v21 = vsel %vm873_vm1, %v858_v18, 0  ;;  %v203_v23 = vpop.f32.mrf.mxu0  ;;  %v353_v24 = vpop.f32.mrf.mxu1 }
 0x13a   :  { %v1910_v25 = vand.u32 4294901760, %v878_v21  ;;  %v350_v26 = vadd.f32 %v349_v13, %v203_v23  ;;  %v433_v28 = vpop.f32.mrf.mxu2  ;;  %v944_v29 = vand.u32 4294901760, %v943_v20 }
 0x13b   :  { %v532_v31 = vpop.f32.mrf.mxu3 }
 0x13c   :  { %v1913_v32 = vsub.f32 %v878_v21, %v1910_v25  ;;  %v434_v33 = vadd.f32 %v433_v28, %v350_v26  ;;  %645 = vmatmul.f32.vlgmr.msrb.gmra.mxu0 %v1813_v16  ;;  %731 = vmatmul.f32.gmra.mxu1 %v1820_v22 }
 0x13d   :  { %945 = vmatmul.f32.vlgmr.msrb.gmra.mxu2 %v944_v29 }
 0x13e   :  { %v1917_v34 = vadd.f32 %v532_v31, %v434_v33  ;;  %v950_v36 = vand.u32 4294901760, %v1913_v32 }
 0x140   :  { %v859_v38 = vpop.trf.xlu0  ;;  %1100 = vmatmul.f32.gmra.mxu3 %v1910_v25  ;;  %v951_v39 = vsub.f32 %v1913_v32, %v950_v36 }
 0x141   :  { %v881_v40 = vsel %vm873_vm1, %v859_v38, 0  ;;  %v211_v41 = vpop.f32.mrf.mxu0  ;;  %v357_v42 = vpop.f32.mrf.mxu1 }
 0x142   :  { %v1925_v45 = vand.u32 4294901760, %v881_v40  ;;  %v354_v16 = vadd.f32 %v353_v24, %v211_v41  ;;  %v438_v46 = vpop.f32.mrf.mxu2  ;;  %v952_v47 = vand.u32 4294901760, %v951_v39 }
 0x143   :  { %v538_v48 = vpop.f32.mrf.mxu3 }
 0x144   :  { %v1928_v49 = vsub.f32 %v881_v40, %v1925_v45  ;;  %v439_v50 = vadd.f32 %v438_v46, %v354_v16  ;;  %649 = vmatmul.f32.gmra.mxu0 %v1820_v22  ;;  %735 = vmatmul.f32.gmra.mxu1 %v1826_v30 }
 0x145   :  { %953 = vmatmul.f32.gmra.mxu2 %v952_v47 }
 0x146   :  { %v1932_v53 = vadd.f32 %v538_v48, %v439_v50  ;;  %v2348_v54 = vand.u32 4294901760, %v1928_v49 }
 0x148   :  { %v860_v55 = vpop.trf.xlu0  ;;  %1104 = vmatmul.f32.gmra.mxu3 %v1925_v45  ;;  %v959_v56 = vsub.f32 %v1928_v49, %v2348_v54 }
 0x149   :  { %v884_v57 = vsel %vm873_vm1, %v860_v55, 0  ;;  %v219_v58 = vpop.f32.mrf.mxu0  ;;  %v361_v61 = vpop.f32.mrf.mxu1 }
 0x14a   :  { %v1940_v62 = vand.u32 4294901760, %v884_v57  ;;  %v358_v22 = vadd.f32 %v357_v42, %v219_v58  ;;  %v443_v63 = vpop.f32.mrf.mxu2  ;;  %v960_v0 = vand.u32 4294901760, %v959_v56 }
 0x14b   :  { %v544_v1 = vpop.f32.mrf.mxu3 }
 0x14c   :  { %v1943_v2 = vsub.f32 %v884_v57, %v1940_v62  ;;  %v444_v7 = vadd.f32 %v443_v63, %v358_v22  ;;  %653 = vmatmul.f32.gmra.mxu0 %v1826_v30  ;;  %739 = vmatmul.f32.gmra.mxu1 %v1831_v37 }
 0x14d   :  { %961 = vmatmul.f32.gmra.mxu2 %v960_v0 }
 0x14e   :  { %v1947_v8 = vadd.f32 %v544_v1, %v444_v7  ;;  %v2346_v9 = vand.u32 4294901760, %v1943_v2 }
 0x150   :  { %v861_v10 = vpop.trf.xlu0  ;;  %1108 = vmatmul.f32.gmra.mxu3 %v1940_v62  ;;  %v967_v4 = vsub.f32 %v1943_v2, %v2346_v9 }
 0x151   :  { %v887_v11 = vsel %vm873_vm1, %v861_v10, 0  ;;  %v227_v13 = vpop.f32.mrf.mxu0  ;;  %v365_v14 = vpop.f32.mrf.mxu1 }
 0x152   :  { %v1955_v18 = vand.u32 4294901760, %v887_v11  ;;  %v362_v30 = vadd.f32 %v361_v61, %v227_v13  ;;  %v448_v20 = vpop.f32.mrf.mxu2  ;;  %v968_v21 = vand.u32 4294901760, %v967_v4 }
 0x153   :  { %v550_v23 = vpop.f32.mrf.mxu3 }
 0x154   :  { %v1958_v24 = vsub.f32 %v887_v11, %v1955_v18  ;;  %v449_v26 = vadd.f32 %v448_v20, %v362_v30  ;;  %657 = vmatmul.f32.gmra.mxu0 %v1831_v37  ;;  %743 = vmatmul.f32.gmra.mxu1 %v1836_v44 }
 0x155   :  { %969 = vmatmul.f32.gmra.mxu2 %v968_v21 }
 0x156   :  { %v1962_v28 = vadd.f32 %v550_v23, %v449_v26  ;;  %v2344_v29 = vand.u32 4294901760, %v1958_v24 }
 0x158   :  { %v862_v31 = vpop.trf.xlu0  ;;  %1112 = vmatmul.f32.gmra.mxu3 %v1955_v18  ;;  %v975_v33 = vsub.f32 %v1958_v24, %v2344_v29 }
 0x159   :  { %v890_v38 = vsel %vm873_vm1, %v862_v31, 0  ;;  %v235_v39 = vpop.f32.mrf.mxu0  ;;  %v369_v40 = vpop.f32.mrf.mxu1 }
 0x15a   :  { %v1970_v41 = vand.u32 4294901760, %v890_v38  ;;  %v366_v37 = vadd.f32 %v365_v14, %v235_v39  ;;  %v453_v42 = vpop.f32.mrf.mxu2  ;;  %v976_v16 = vand.u32 4294901760, %v975_v33 }
 0x15b   :  { %v556_v46 = vpop.f32.mrf.mxu3 }
 0x15c   :  { %v1973_v47 = vsub.f32 %v890_v38, %v1970_v41  ;;  %v454_v48 = vadd.f32 %v453_v42, %v366_v37  ;;  %661 = vmatmul.f32.gmra.mxu0 %v1836_v44  ;;  %747 = vmatmul.f32.gmra.mxu1 %v1841_v51 }
 0x15d   :  { %977 = vmatmul.f32.gmra.mxu2 %v976_v16 }
 0x15e   :  { %v1977_v50 = vadd.f32 %v556_v46, %v454_v48  ;;  %v2343_v55 = vand.u32 4294901760, %v1973_v47 }
 0x160   :  { %v863_v56 = vpop.trf.xlu0  ;;  %1116 = vmatmul.f32.gmra.mxu3 %v1970_v41  ;;  %v983_v57 = vsub.f32 %v1973_v47, %v2343_v55 }
 0x161   :  { %v893_v58 = vsel %vm873_vm1, %v863_v56, 0  ;;  %v243_v61 = vpop.f32.mrf.mxu0  ;;  %v373_v22 = vpop.f32.mrf.mxu1 }
 0x162   :  { %v1985_v63 = vand.u32 4294901760, %v893_v58  ;;  %v370_v44 = vadd.f32 %v369_v40, %v243_v61  ;;  %v458_v0 = vpop.f32.mrf.mxu2  ;;  %v984_v1 = vand.u32 4294901760, %v983_v57 }
 0x163   :  { %v562_v7 = vpop.f32.mrf.mxu3 }
 0x164   :  { %v1988_v10 = vsub.f32 %v893_v58, %v1985_v63  ;;  %v459_v4 = vadd.f32 %v458_v0, %v370_v44  ;;  %665 = vmatmul.f32.gmra.mxu0 %v1841_v51  ;;  %751 = vmatmul.f32.gmra.mxu1 %v1846_v60 }
 0x165   :  { %985 = vmatmul.f32.gmra.mxu2 %v984_v1 }
 0x166   :  { %v1992_v11 = vadd.f32 %v562_v7, %v459_v4  ;;  %v2341_v13 = vand.u32 4294901760, %v1988_v10 }
 0x168   :  { %v864_v14 = vpop.trf.xlu0  ;;  %1120 = vmatmul.f32.gmra.mxu3 %v1985_v63  ;;  %v991_v30 = vsub.f32 %v1988_v10, %v2341_v13 }
 0x169   :  { %v896_v20 = vsel %vm873_vm1, %v864_v14, 0  ;;  %v251_v21 = vpop.f32.mrf.mxu0  ;;  %v377_v23 = vpop.f32.mrf.mxu1 }
 0x16a   :  { %v2000_v26 = vand.u32 4294901760, %v896_v20  ;;  %v374_v51 = vadd.f32 %v373_v22, %v251_v21  ;;  %v463_v31 = vpop.f32.mrf.mxu2  ;;  %v992_v33 = vand.u32 4294901760, %v991_v30 }
 0x16b   :  { %v568_v38 = vpop.f32.mrf.mxu3 }
 0x16c   :  { %v2003_v39 = vsub.f32 %v896_v20, %v2000_v26  ;;  %v464_v40 = vadd.f32 %v463_v31, %v374_v51  ;;  %669 = vmatmul.f32.gmra.mxu0 %v1846_v60  ;;  %755 = vmatmul.f32.gmra.mxu1 %v1853_v5 }
 0x16d   :  { %993 = vmatmul.f32.gmra.mxu2 %v992_v33 }
 0x16e   :  { %v2007_v37 = vadd.f32 %v568_v38, %v464_v40  ;;  %v2340_v42 = vand.u32 4294901760, %v2003_v39 }
 0x170   :  { %v865_v16 = vpop.trf.xlu0  ;;  %1124 = vmatmul.f32.gmra.mxu3 %v2000_v26  ;;  %v999_v46 = vsub.f32 %v2003_v39, %v2340_v42 }
 0x171   :  { %v899_v48 = vsel %vm873_vm1, %v865_v16, 0  ;;  %v259_v56 = vpop.f32.mrf.mxu0  ;;  %v381_v57 = vpop.f32.mrf.mxu1 }
 0x172   :  { %v2015_v58 = vand.u32 4294901760, %v899_v48  ;;  %v378_v60 = vadd.f32 %v377_v23, %v259_v56  ;;  %v468_v61 = vpop.f32.mrf.mxu2  ;;  %v1000_v22 = vand.u32 4294901760, %v999_v46 }
 0x173   :  { %v574_v44 = vpop.f32.mrf.mxu3 }
 0x174   :  { %v2018_v0 = vsub.f32 %v899_v48, %v2015_v58  ;;  %v469_v1 = vadd.f32 %v468_v61, %v378_v60  ;;  %673 = vmatmul.f32.gmra.mxu0 %v1853_v5  ;;  %759 = vmatmul.f32.gmra.mxu1 %v1858_v12 }
 0x175   :  { %1001 = vmatmul.f32.gmra.mxu2 %v1000_v22 }
 0x176   :  { %v2338_v7 = vand.u32 4294901760, %v2018_v0  ;;  %v2023_v4 = vadd.f32 %v574_v44, %v469_v1 }
 0x178   :  { %v866_v14 = vpop.trf.xlu0  ;;  %1128 = vmatmul.f32.gmra.mxu3 %v2015_v58  ;;  %v1007_v30 = vsub.f32 %v2018_v0, %v2338_v7 }
 0x179   :  { %v902_v20 = vsel %vm873_vm1, %v866_v14, 0  ;;  %v267_v21 = vpop.f32.mrf.mxu0  ;;  %v385_v23 = vpop.f32.mrf.mxu1 }
 0x17a   :  { %v2030_v51 = vand.u32 4294901760, %v902_v20  ;;  %v382_v5 = vadd.f32 %v381_v57, %v267_v21  ;;  %v473_v31 = vpop.f32.mrf.mxu2  ;;  %v1008_v33 = vand.u32 4294901760, %v1007_v30 }
 0x17b   :  { %v580_v38 = vpop.f32.mrf.mxu3 }
 0x17c   :  { %v2033_v40 = vsub.f32 %v902_v20, %v2030_v51  ;;  %v474_v16 = vadd.f32 %v473_v31, %v382_v5  ;;  %677 = vmatmul.f32.gmra.mxu0 %v1858_v12  ;;  %763 = vmatmul.f32.gmra.mxu1 %v1863_v19 }
 0x17d   :  { %1009 = vmatmul.f32.gmra.mxu2 %v1008_v33 }
 0x17e   :  { %v2337_v46 = vand.u32 4294901760, %v2033_v40  ;;  %v2038_v48 = vadd.f32 %v580_v38, %v474_v16 }
 0x180   :  { %v867_v56 = vpop.trf.xlu0  ;;  %1132 = vmatmul.f32.gmra.mxu3 %v2030_v51  ;;  %v1015_v57 = vsub.f32 %v2033_v40, %v2337_v46 }
 0x181   :  { %v905_v60 = vsel %vm873_vm1, %v867_v56, 0  ;;  %v275_v61 = vpop.f32.mrf.mxu0  ;;  %v389_v22 = vpop.f32.mrf.mxu1 }
 0x182   :  { %v2045_v44 = vand.u32 4294901760, %v905_v60  ;;  %v386_v12 = vadd.f32 %v385_v23, %v275_v61  ;;  %v478_v1 = vpop.f32.mrf.mxu2  ;;  %v1016_v14 = vand.u32 4294901760, %v1015_v57 }
 0x183   :  { %v586_v30 = vpop.f32.mrf.mxu3 }
 0x184   :  { %v2048_v20 = vsub.f32 %v905_v60, %v2045_v44  ;;  %v479_v21 = vadd.f32 %v478_v1, %v386_v12  ;;  %681 = vmatmul.f32.gmra.mxu0 %v1863_v19  ;;  %767 = vmatmul.f32.gmra.mxu1 %v1868_v27 }
 0x185   :  { %1017 = vmatmul.f32.gmra.mxu2 %v1016_v14 }
 0x186   :  { %v2335_v5 = vand.u32 4294901760, %v2048_v20  ;;  %v2053_v31 = vadd.f32 %v586_v30, %v479_v21 }
 0x188   :  { %v868_v33 = vpop.trf.xlu0  ;;  %1136 = vmatmul.f32.gmra.mxu3 %v2045_v44  ;;  %v1023_v23 = vsub.f32 %v2048_v20, %v2335_v5 }
 0x189   :  { %v908_v38 = vsel %vm873_vm1, %v868_v33, 0  ;;  %v283_v16 = vpop.f32.mrf.mxu0  ;;  %v393_v56 = vpop.f32.mrf.mxu1 }
 0x18a   :  { %v2060_v57 = vand.u32 4294901760, %v908_v38  ;;  %v390_v19 = vadd.f32 %v389_v22, %v283_v16  ;;  %v483_v60 = vpop.f32.mrf.mxu2  ;;  %v1024_v61 = vand.u32 4294901760, %v1023_v23 }
 0x18b   :  { %v592_v12 = vpop.f32.mrf.mxu3 }
 0x18c   :  { %v2063_v1 = vsub.f32 %v908_v38, %v2060_v57  ;;  %v484_v14 = vadd.f32 %v483_v60, %v390_v19  ;;  %685 = vmatmul.f32.gmra.mxu0 %v1868_v27  ;;  %771 = vmatmul.f32.gmra.mxu1 %v1873_v35 }
 0x18d   :  { %1025 = vmatmul.f32.gmra.mxu2 %v1024_v61 }
 0x18e   :  { %v2336_v30 = vand.u32 4294901760, %v2063_v1  ;;  %v2068_v21 = vadd.f32 %v592_v12, %v484_v14 }
 0x190   :  { %v869_v33 = vpop.trf.xlu0  ;;  %1140 = vmatmul.f32.gmra.mxu3 %v2060_v57  ;;  %v1031_v22 = vsub.f32 %v2063_v1, %v2336_v30 }
 0x191   :  { %v911_v23 = vsel %vm873_vm1, %v869_v33, 0  ;;  %v291_v38 = vpop.f32.mrf.mxu0  ;;  %v397_v16 = vpop.f32.mrf.mxu1 }
 0x192   :  { %v2075_v19 = vand.u32 4294901760, %v911_v23  ;;  %v394_v27 = vadd.f32 %v393_v56, %v291_v38  ;;  %v488_v60 = vpop.f32.mrf.mxu2  ;;  %v1032_v61 = vand.u32 4294901760, %v1031_v22 }
 0x193   :  { %v598_v5 = vpop.f32.mrf.mxu3 }
 0x194   :  { %v2078_v12 = vsub.f32 %v911_v23, %v2075_v19  ;;  %v489_v14 = vadd.f32 %v488_v60, %v394_v27  ;;  %689 = vmatmul.f32.gmra.mxu0 %v1873_v35  ;;  %775 = vmatmul.f32.gmra.mxu1 %v1878_v43 }
 0x195   :  { %1033 = vmatmul.f32.gmra.mxu2 %v1032_v61 }
 0x196   :  { %v2339_v30 = vand.u32 4294901760, %v2078_v12  ;;  %v2083_v33 = vadd.f32 %v598_v5, %v489_v14 }
 0x198   :  { %v870_v46 = vpop.trf.xlu0  ;;  %1144 = vmatmul.f32.gmra.mxu3 %v2075_v19  ;;  %v1039_v56 = vsub.f32 %v2078_v12, %v2339_v30 }
 0x199   :  { %v914_v22 = vsel %vm873_vm1, %v870_v46, 0  ;;  %v299_v23 = vpop.f32.mrf.mxu0  ;;  %v401_v38 = vpop.f32.mrf.mxu1 }
 0x19a   :  { %v2090_v27 = vand.u32 4294901760, %v914_v22  ;;  %v398_v35 = vadd.f32 %v397_v16, %v299_v23  ;;  %v493_v60 = vpop.f32.mrf.mxu2  ;;  %v1040_v61 = vand.u32 4294901760, %v1039_v56 }
 0x19b   :  { %v604_v7 = vpop.f32.mrf.mxu3 }
 0x19c   :  { %v2093_v5 = vsub.f32 %v914_v22, %v2090_v27  ;;  %v494_v14 = vadd.f32 %v493_v60, %v398_v35  ;;  %693 = vmatmul.f32.gmra.mxu0 %v1878_v43  ;;  %779 = vmatmul.f32.gmra.mxu1 %v1883_v52 }
 0x19d   :  { %1041 = vmatmul.f32.gmra.mxu2 %v1040_v61 }
 0x19e   :  { %v2342_v30 = vand.u32 4294901760, %v2093_v5  ;;  %v2098_v46 = vadd.f32 %v604_v7, %v494_v14 }
 0x1a0   :  { %v871_v42 = vpop.trf.xlu0  ;;  %1148 = vmatmul.f32.gmra.mxu3 %v2090_v27  ;;  %v1047_v16 = vsub.f32 %v2093_v5, %v2342_v30 }
 0x1a1   :  { %v917_v56 = vsel %vm873_vm1, %v871_v42, 0  ;;  %v307_v22 = vpop.f32.mrf.mxu0  ;;  %v405_v23 = vpop.f32.mrf.mxu1 }
 0x1a2   :  { %v2105_v35 = vand.u32 4294901760, %v917_v56  ;;  %v402_v43 = vadd.f32 %v401_v38, %v307_v22  ;;  %v498_v60 = vpop.f32.mrf.mxu2  ;;  %v1048_v61 = vand.u32 4294901760, %v1047_v16 }
 0x1a3   :  { %v610_v13 = vpop.f32.mrf.mxu3 }
 0x1a4   :  { %v2108_v7 = vsub.f32 %v917_v56, %v2105_v35  ;;  %v499_v14 = vadd.f32 %v498_v60, %v402_v43  ;;  %697 = vmatmul.f32.gmra.mxu0 %v1883_v52  ;;  %783 = vmatmul.f32.gmra.mxu1 %v1888_v59 }
 0x1a5   :  { %1049 = vmatmul.f32.gmra.mxu2 %v1048_v61 }
 0x1a6   :  { %v2345_v30 = vand.u32 4294901760, %v2108_v7  ;;  %v2113_v42 = vadd.f32 %v610_v13, %v499_v14 }
 0x1a8   :  { %v872_v55 = vpop.trf.xlu0  ;;  %1152 = vmatmul.f32.gmra.mxu3 %v2105_v35  ;;  %v1055_v38 = vsub.f32 %v2108_v7, %v2345_v30 }
 0x1a9   :  { %v920_v16 = vsel %vm873_vm1, %v872_v55, 0  ;;  %v315_v56 = vpop.f32.mrf.mxu0  ;;  %v409_v22 = vpop.f32.mrf.mxu1 }
 0x1aa   :  { %v2120_v43 = vand.u32 4294901760, %v920_v16  ;;  %v406_v52 = vadd.f32 %v405_v23, %v315_v56  ;;  %v503_v60 = vpop.f32.mrf.mxu2  ;;  %v1056_v61 = vand.u32 4294901760, %v1055_v38 }
 0x1ab   :  { %v616_v29 = vpop.f32.mrf.mxu3 }
 0x1ac   :  { %v2123_v13 = vsub.f32 %v920_v16, %v2120_v43  ;;  %v504_v14 = vadd.f32 %v503_v60, %v406_v52  ;;  %701 = vmatmul.f32.gmra.mxu0 %v1888_v59  ;;  %787 = vmatmul.f32.gmra.mxu1 %v1893_v3 }
 0x1ad   :  { %1057 = vmatmul.f32.gmra.mxu2 %v1056_v61 }
 0x1ae   :  { %v2347_v30 = vand.u32 4294901760, %v2123_v13  ;;  %v2128_v55 = vadd.f32 %v616_v29, %v504_v14 }
 0x1b0   :  { %1156 = vmatmul.f32.gmra.mxu3 %v2120_v43  ;;  %v1063_v23 = vsub.f32 %v2123_v13, %v2347_v30 }
 0x1b1   :  { %v323_v38 = vpop.f32.mrf.mxu0  ;;  %v728_v56 = vpop.f32.mrf.mxu1 }
 0x1b2   :  { %v410_v16 = vadd.f32 %v409_v22, %v323_v38  ;;  %v1064_v9 = vand.u32 4294901760, %v1063_v23  ;;  %v508_v52 = vpop.f32.mrf.mxu2 }
 0x1b3   :  { %v622_v60 = vpop.f32.mrf.mxu3 }
 0x1b4   :  { %v509_v59 = vadd.f32 %v508_v52, %v410_v16  ;;  %705 = vmatmul.f32.gmra.mxu0 %v1893_v3  ;;  %1282 = vmatmul.f32.vlgmr.msra.gmra.mxu1 %v942_v17 }
 0x1b5   :  { %1065 = vmatmul.f32.gmra.mxu2 %v1064_v9 }
 0x1b6   :  { %v2137_v29 = vadd.f32 %v622_v60, %v509_v59 }
 0x1b8   :  { %1482 = vmatmul.f32.vlgmr.msra.gmra.mxu3 %v1898_v6 }
 0x1b9   :  { %v646_v61 = vpop.f32.mrf.mxu0  ;;  %v732_v14 = vpop.f32.mrf.mxu1 }
 0x1ba   :  { %v647_v30 = vadd.f32 %v646_v61, %v1917_v34 }
 0x1bb   :  { %v1097_v54 = vpop.f32.mrf.mxu3 }
 0x1bc   :  { %v2141_v22 = vadd.f32 %v728_v56, %v647_v30  ;;  %1182 = vmatmul.f32.vlgmr.msra.gmra.mxu0 %v1901_v15  ;;  %1288 = vmatmul.f32.gmra.mxu1 %v950_v36  ;;  %v2349_v15 = vand.u32 4294901760, %v1928_v49 }
 0x1bd   :  { %1399 = vmatmul.f32.vlgmr.msra.gmra.mxu2 %v1898_v6 }
 0x1c0   :  { %v946_v3 = vpop.f32.mrf.mxu2  ;;  %1486 = vmatmul.f32.gmra.mxu3 %v1910_v25 }
 0x1c1   :  { %v2148_v17 = vadd.f32 %v1097_v54, %v946_v3  ;;  %v650_v9 = vpop.f32.mrf.mxu0  ;;  %v736_v23 = vpop.f32.mrf.mxu1 }
 0x1c2   :  { %v651_v38 = vadd.f32 %v650_v9, %v1932_v53 }
 0x1c3   :  { %v1101_v34 = vpop.f32.mrf.mxu3 }
 0x1c4   :  { %v2151_v16 = vadd.f32 %v732_v14, %v651_v38  ;;  %1187 = vmatmul.f32.gmra.mxu0 %v1913_v32  ;;  %1294 = vmatmul.f32.gmra.mxu1 %v2349_v15  ;;  %v2350_v32 = vand.u32 4294901760, %v1943_v2 }
 0x1c5   :  { %1403 = vmatmul.f32.gmra.mxu2 %v1910_v25 }
 0x1c8   :  { %v954_v6 = vpop.f32.mrf.mxu2  ;;  %1490 = vmatmul.f32.gmra.mxu3 %v1925_v45 }
 0x1c9   :  { %v2158_v36 = vadd.f32 %v1101_v34, %v954_v6  ;;  %v654_v54 = vpop.f32.mrf.mxu0  ;;  %v740_v30 = vpop.f32.mrf.mxu1 }
 0x1ca   :  { %v655_v56 = vadd.f32 %v654_v54, %v1947_v8 }
 0x1cb   :  { %v1105_v53 = vpop.f32.mrf.mxu3 }
 0x1cc   :  { %v2161_v52 = vadd.f32 %v736_v23, %v655_v56  ;;  %1192 = vmatmul.f32.gmra.mxu0 %v1928_v49  ;;  %1300 = vmatmul.f32.gmra.mxu1 %v2350_v32  ;;  %v2351_v49 = vand.u32 4294901760, %v1958_v24 }
 0x1cd   :  { %1407 = vmatmul.f32.gmra.mxu2 %v1925_v45 }
 0x1d0   :  { %v962_v25 = vpop.f32.mrf.mxu2  ;;  %1494 = vmatmul.f32.gmra.mxu3 %v1940_v62 }
 0x1d1   :  { %v2168_v60 = vadd.f32 %v1105_v53, %v962_v25  ;;  %v658_v59 = vpop.f32.mrf.mxu0  ;;  %v744_v61 = vpop.f32.mrf.mxu1 }
 0x1d2   :  { %v659_v14 = vadd.f32 %v658_v59, %v1962_v28 }
 0x1d3   :  { %v1109_v8 = vpop.f32.mrf.mxu3 }
 0x1d4   :  { %v2171_v3 = vadd.f32 %v740_v30, %v659_v14  ;;  %1197 = vmatmul.f32.gmra.mxu0 %v1943_v2  ;;  %1306 = vmatmul.f32.gmra.mxu1 %v2351_v49  ;;  %v2352_v2 = vand.u32 4294901760, %v1973_v47 }
 0x1d5   :  { %1411 = vmatmul.f32.gmra.mxu2 %v1940_v62 }
 0x1d8   :  { %v970_v45 = vpop.f32.mrf.mxu2  ;;  %1498 = vmatmul.f32.gmra.mxu3 %v1955_v18 }
 0x1d9   :  { %v2178_v9 = vadd.f32 %v1109_v8, %v970_v45  ;;  %v662_v23 = vpop.f32.mrf.mxu0  ;;  %v748_v38 = vpop.f32.mrf.mxu1 }
 0x1da   :  { %v663_v34 = vadd.f32 %v662_v23, %v1977_v50 }
 0x1db   :  { %v1113_v28 = vpop.f32.mrf.mxu3 }
 0x1dc   :  { %v2181_v15 = vadd.f32 %v744_v61, %v663_v34  ;;  %1202 = vmatmul.f32.gmra.mxu0 %v1958_v24  ;;  %1312 = vmatmul.f32.gmra.mxu1 %v2352_v2  ;;  %v2353_v24 = vand.u32 4294901760, %v1988_v10 }
 0x1dd   :  { %1415 = vmatmul.f32.gmra.mxu2 %v1955_v18 }
 0x1e0   :  { %v978_v62 = vpop.f32.mrf.mxu2  ;;  %1502 = vmatmul.f32.gmra.mxu3 %v1970_v41 }
 0x1e1   :  { %v2188_v6 = vadd.f32 %v1113_v28, %v978_v62  ;;  %v666_v54 = vpop.f32.mrf.mxu0  ;;  %v752_v30 = vpop.f32.mrf.mxu1 }
 0x1e2   :  { %v667_v56 = vadd.f32 %v666_v54, %v1992_v11 }
 0x1e3   :  { %v1117_v50 = vpop.f32.mrf.mxu3 }
 0x1e4   :  { %v2191_v53 = vadd.f32 %v748_v38, %v667_v56  ;;  %1207 = vmatmul.f32.gmra.mxu0 %v1973_v47  ;;  %1318 = vmatmul.f32.gmra.mxu1 %v2353_v24  ;;  %v2354_v47 = vand.u32 4294901760, %v2003_v39 }
 0x1e5   :  { %1419 = vmatmul.f32.gmra.mxu2 %v1970_v41 }
 0x1e8   :  { %v986_v18 = vpop.f32.mrf.mxu2  ;;  %1506 = vmatmul.f32.gmra.mxu3 %v1985_v63 }
 0x1e9   :  { %v2198_v32 = vadd.f32 %v1117_v50, %v986_v18  ;;  %v670_v25 = vpop.f32.mrf.mxu0  ;;  %v756_v59 = vpop.f32.mrf.mxu1 }
 0x1ea   :  { %v671_v61 = vadd.f32 %v670_v25, %v2007_v37 }
 0x1eb   :  { %v1121_v11 = vpop.f32.mrf.mxu3 }
 0x1ec   :  { %v2201_v14 = vadd.f32 %v752_v30, %v671_v61  ;;  %1212 = vmatmul.f32.gmra.mxu0 %v1988_v10  ;;  %1324 = vmatmul.f32.gmra.mxu1 %v2354_v47  ;;  %v2355_v10 = vand.u32 4294901760, %v2018_v0 }
 0x1ed   :  { %1423 = vmatmul.f32.gmra.mxu2 %v1985_v63 }
 0x1f0   :  { %v994_v41 = vpop.f32.mrf.mxu2  ;;  %1510 = vmatmul.f32.gmra.mxu3 %v2000_v26 }
 0x1f1   :  { %v2208_v8 = vadd.f32 %v1121_v11, %v994_v41  ;;  %v674_v49 = vpop.f32.mrf.mxu0  ;;  %v760_v45 = vpop.f32.mrf.mxu1 }
 0x1f2   :  { %v675_v23 = vadd.f32 %v674_v49, %v2023_v4 }
 0x1f3   :  { %v1125_v37 = vpop.f32.mrf.mxu3 }
 0x1f4   :  { %v2211_v38 = vadd.f32 %v756_v59, %v675_v23  ;;  %1217 = vmatmul.f32.gmra.mxu0 %v2003_v39  ;;  %1330 = vmatmul.f32.gmra.mxu1 %v2355_v10  ;;  %v2356_v39 = vand.u32 4294901760, %v2033_v40 }
 0x1f5   :  { %1427 = vmatmul.f32.gmra.mxu2 %v2000_v26 }
 0x1f8   :  { %v1002_v63 = vpop.f32.mrf.mxu2  ;;  %1514 = vmatmul.f32.gmra.mxu3 %v2015_v58 }
 0x1f9   :  { %v2218_v34 = vadd.f32 %v1125_v37, %v1002_v63  ;;  %v678_v28 = vpop.f32.mrf.mxu0  ;;  %v764_v2 = vpop.f32.mrf.mxu1 }
 0x1fa   :  { %v679_v62 = vadd.f32 %v678_v28, %v2038_v48 }
 0x1fb   :  { %v1129_v4 = vpop.f32.mrf.mxu3 }
 0x1fc   :  { %v2221_v54 = vadd.f32 %v760_v45, %v679_v62  ;;  %1222 = vmatmul.f32.gmra.mxu0 %v2018_v0  ;;  %1336 = vmatmul.f32.gmra.mxu1 %v2356_v39  ;;  %v2357_v0 = vand.u32 4294901760, %v2048_v20 }
 0x1fd   :  { %1431 = vmatmul.f32.gmra.mxu2 %v2015_v58 }
 0x200   :  { %v1010_v26 = vpop.f32.mrf.mxu2  ;;  %1518 = vmatmul.f32.gmra.mxu3 %v2030_v51 }
 0x201   :  { %v2228_v30 = vadd.f32 %v1129_v4, %v1010_v26  ;;  %v682_v56 = vpop.f32.mrf.mxu0  ;;  %v768_v50 = vpop.f32.mrf.mxu1 }
 0x202   :  { %v683_v24 = vadd.f32 %v682_v56, %v2053_v31 }
 0x203   :  { %v1133_v48 = vpop.f32.mrf.mxu3 }
 0x204   :  { %v2231_v18 = vadd.f32 %v764_v2, %v683_v24  ;;  %1227 = vmatmul.f32.gmra.mxu0 %v2033_v40  ;;  %1342 = vmatmul.f32.gmra.mxu1 %v2357_v0  ;;  %v2358_v40 = vand.u32 4294901760, %v2063_v1 }
 0x205   :  { %1435 = vmatmul.f32.gmra.mxu2 %v2030_v51 }
 0x208   :  { %v1018_v58 = vpop.f32.mrf.mxu2  ;;  %1522 = vmatmul.f32.gmra.mxu3 %v2045_v44 }
 0x209   :  { %v2238_v25 = vadd.f32 %v1133_v48, %v1018_v58  ;;  %v686_v59 = vpop.f32.mrf.mxu0  ;;  %v772_v61 = vpop.f32.mrf.mxu1 }
 0x20a   :  { %v687_v11 = vadd.f32 %v686_v59, %v2068_v21 }
 0x20b   :  { %v1137_v31 = vpop.f32.mrf.mxu3 }
 0x20c   :  { %v2241_v47 = vadd.f32 %v768_v50, %v687_v11  ;;  %1232 = vmatmul.f32.gmra.mxu0 %v2048_v20  ;;  %1348 = vmatmul.f32.gmra.mxu1 %v2358_v40  ;;  %v2359_v20 = vand.u32 4294901760, %v2078_v12 }
 0x20d   :  { %1439 = vmatmul.f32.gmra.mxu2 %v2045_v44 }
 0x210   :  { %v1026_v51 = vpop.f32.mrf.mxu2  ;;  %1526 = vmatmul.f32.gmra.mxu3 %v2060_v57 }
 0x211   :  { %v2248_v41 = vadd.f32 %v1137_v31, %v1026_v51  ;;  %v690_v49 = vpop.f32.mrf.mxu0  ;;  %v776_v45 = vpop.f32.mrf.mxu1 }
 0x212   :  { %v691_v23 = vadd.f32 %v690_v49, %v2083_v33 }
 0x213   :  { %v1141_v21 = vpop.f32.mrf.mxu3 }
 0x214   :  { %v2251_v37 = vadd.f32 %v772_v61, %v691_v23  ;;  %1237 = vmatmul.f32.gmra.mxu0 %v2063_v1  ;;  %1354 = vmatmul.f32.gmra.mxu1 %v2359_v20  ;;  %v2360_v1 = vand.u32 4294901760, %v2093_v5 }
 0x215   :  { %1443 = vmatmul.f32.gmra.mxu2 %v2060_v57 }
 0x218   :  { %v1034_v44 = vpop.f32.mrf.mxu2  ;;  %1530 = vmatmul.f32.gmra.mxu3 %v2075_v19 }
 0x219   :  { %v2258_v10 = vadd.f32 %v1141_v21, %v1034_v44  ;;  %v694_v63 = vpop.f32.mrf.mxu0  ;;  %v780_v28 = vpop.f32.mrf.mxu1 }
 0x21a   :  { %v695_v2 = vadd.f32 %v694_v63, %v2098_v46 }
 0x21b   :  { %v1145_v33 = vpop.f32.mrf.mxu3 }
 0x21c   :  { %v2261_v62 = vadd.f32 %v776_v45, %v695_v2  ;;  %1242 = vmatmul.f32.gmra.mxu0 %v2078_v12  ;;  %1360 = vmatmul.f32.gmra.mxu1 %v2360_v1  ;;  %v2361_v12 = vand.u32 4294901760, %v2108_v7 }
 0x21d   :  { %1447 = vmatmul.f32.gmra.mxu2 %v2075_v19 }
 0x220   :  { %v1042_v57 = vpop.f32.mrf.mxu2  ;;  %1534 = vmatmul.f32.gmra.mxu3 %v2090_v27 }
 0x221   :  { %v2268_v4 = vadd.f32 %v1145_v33, %v1042_v57  ;;  %v698_v39 = vpop.f32.mrf.mxu0  ;;  %v784_v26 = vpop.f32.mrf.mxu1 }
 0x222   :  { %v699_v56 = vadd.f32 %v698_v39, %v2113_v42 }
 0x223   :  { %v1149_v46 = vpop.f32.mrf.mxu3 }
 0x224   :  { %v2271_v50 = vadd.f32 %v780_v28, %v699_v56  ;;  %1247 = vmatmul.f32.gmra.mxu0 %v2093_v5  ;;  %1366 = vmatmul.f32.gmra.mxu1 %v2361_v12  ;;  %v2362_v5 = vand.u32 4294901760, %v2123_v13 }
 0x225   :  { %1451 = vmatmul.f32.gmra.mxu2 %v2090_v27 }
 0x228   :  { %v1050_v19 = vpop.f32.mrf.mxu2  ;;  %1538 = vmatmul.f32.gmra.mxu3 %v2105_v35 }
 0x229   :  { %v2278_v24 = vadd.f32 %v1149_v46, %v1050_v19  ;;  %v702_v48 = vpop.f32.mrf.mxu0  ;;  %v788_v0 = vpop.f32.mrf.mxu1 }
 0x22a   :  { %v703_v58 = vadd.f32 %v702_v48, %v2128_v55 }
 0x22b   :  { %v1153_v42 = vpop.f32.mrf.mxu3 }
 0x22c   :  { %v2281_v59 = vadd.f32 %v784_v26, %v703_v58  ;;  %1252 = vmatmul.f32.gmra.mxu0 %v2108_v7  ;;  %1372 = vmatmul.f32.gmra.mxu1 %v2362_v5 }
 0x22d   :  { %1455 = vmatmul.f32.gmra.mxu2 %v2105_v35 }
 0x230   :  { %v1058_v27 = vpop.f32.mrf.mxu2  ;;  %1542 = vmatmul.f32.gmra.mxu3 %v2120_v43 }
 0x231   :  { %v2288_v61 = vadd.f32 %v1153_v42, %v1058_v27  ;;  %v706_v11 = vpop.f32.mrf.mxu0  ;;  %v1283_v31 = vpop.f32.mrf.mxu1 }
 0x232   :  { %v707_v40 = vadd.f32 %v706_v11, %v2137_v29 }
 0x233   :  { %v1157_v55 = vpop.f32.mrf.mxu3 }
 0x234   :  { %v2291_v51 = vadd.f32 %v788_v0, %v707_v40  ;;  %1257 = vmatmul.f32.gmra.mxu0 %v2123_v13 }
 0x235   :  { %1459 = vmatmul.f32.gmra.mxu2 %v2120_v43 }
 0x238   :  { %v1066_v7 = vpop.f32.mrf.mxu2 }
 0x239   :  { %v2295_v49 = vadd.f32 %v1157_v55, %v1066_v7  ;;  %v1183_v35 = vpop.f32.mrf.mxu0  ;;  %v1289_v45 = vpop.f32.mrf.mxu1 }
 0x23a   :  { %v1184_v23 = vadd.f32 %v1183_v35, %v2148_v17 }
 0x23b   :  { %v1483_v21 = vpop.f32.mrf.mxu3 }
 0x23c   :  { %v1284_v20 = vadd.f32 %v1283_v31, %v1184_v23 }
 0x240   :  { %v1400_v44 = vpop.f32.mrf.mxu2 }
 0x241   :  { %v1401_v63 = vadd.f32 %v1400_v44, %v1284_v20  ;;  %v1188_v28 = vpop.f32.mrf.mxu0  ;;  %v1295_v29 = vpop.f32.mrf.mxu1 }
 0x242   :  { %v1189_v2 = vadd.f32 %v1188_v28, %v2158_v36 }
 0x243   :  { %v1484_v33 = vadd.f32 %v1483_v21, %v1401_v63  ;;  %v1487_v1 = vpop.f32.mrf.mxu3 }
 0x244   :  { %v1290_v13 = vadd.f32 %v1289_v45, %v1189_v2 }
 0x245   :  { %v1613_v43 = vmul.f32 %v1484_v33, %v2141_v22 }
 0x248   :  { %v1404_v57 = vpop.f32.mrf.mxu2 }
 0x249   :  { %v1405_v39 = vadd.f32 %v1404_v57, %v1290_v13  ;;  %v1193_v26 = vpop.f32.mrf.mxu0  ;;  %v1301_v56 = vpop.f32.mrf.mxu1 }
 0x24a   :  { %v1194_v46 = vadd.f32 %v1193_v26, %v2168_v60 }
 0x24b   :  { %v1488_v17 = vadd.f32 %v1487_v1, %v1405_v39  ;;  %v1491_v12 = vpop.f32.mrf.mxu3 }
 0x24c   :  { %v1296_v19 = vadd.f32 %v1295_v29, %v1194_v46 }
 0x24d   :  { %v1614_v48 = vmul.f32 %v1488_v17, %v2151_v16 }
 0x24f   :  { %v1629_v0 = vadd.f32 %v1614_v48, %v1613_v43 }
 0x250   :  { %v1408_v58 = vpop.f32.mrf.mxu2 }
 0x251   :  { %v1409_v42 = vadd.f32 %v1408_v58, %v1296_v19  ;;  %v1198_v36 = vpop.f32.mrf.mxu0  ;;  %v1307_v5 = vpop.f32.mrf.mxu1 }
 0x252   :  { %v1199_v27 = vadd.f32 %v1198_v36, %v2178_v9 }
 0x253   :  { %v1492_v11 = vadd.f32 %v1491_v12, %v1409_v42  ;;  %v1495_v22 = vpop.f32.mrf.mxu3 }
 0x254   :  { %v1302_v31 = vadd.f32 %v1301_v56, %v1199_v27 }
 0x255   :  { %v1615_v40 = vmul.f32 %v1492_v11, %v2161_v52 }
 0x257   :  { %v1630_v55 = vadd.f32 %v1629_v0, %v1615_v40 }
 0x258   :  { %v1412_v7 = vpop.f32.mrf.mxu2 }
 0x259   :  { %v1413_v60 = vadd.f32 %v1412_v7, %v1302_v31  ;;  %v1203_v35 = vpop.f32.mrf.mxu0  ;;  %v1313_v45 = vpop.f32.mrf.mxu1 }
 0x25a   :  { %v1204_v23 = vadd.f32 %v1203_v35, %v2188_v6 }
 0x25b   :  { %v1496_v16 = vadd.f32 %v1495_v22, %v1413_v60  ;;  %v1499_v21 = vpop.f32.mrf.mxu3 }
 0x25c   :  { %v1308_v20 = vadd.f32 %v1307_v5, %v1204_v23 }
 0x25d   :  { %v1616_v44 = vmul.f32 %v1496_v16, %v2171_v3 }
 0x25f   :  { %v1631_v63 = vadd.f32 %v1630_v55, %v1616_v44 }
 0x260   :  { %v1416_v28 = vpop.f32.mrf.mxu2 }
 0x261   :  { %v1417_v9 = vadd.f32 %v1416_v28, %v1308_v20  ;;  %v1208_v29 = vpop.f32.mrf.mxu0  ;;  %v1319_v2 = vpop.f32.mrf.mxu1 }
 0x262   :  { %v1209_v52 = vadd.f32 %v1208_v29, %v2198_v32 }
 0x263   :  { %v1500_v33 = vadd.f32 %v1499_v21, %v1417_v9  ;;  %v1503_v1 = vpop.f32.mrf.mxu3 }
 0x264   :  { %v1314_v57 = vadd.f32 %v1313_v45, %v1209_v52 }
 0x265   :  { %v1617_v13 = vmul.f32 %v1500_v33, %v2181_v15 }
 0x267   :  { %v1632_v43 = vadd.f32 %v1631_v63, %v1617_v13 }
 0x268   :  { %v1420_v39 = vpop.f32.mrf.mxu2 }
 0x269   :  { %v1421_v6 = vadd.f32 %v1420_v39, %v1314_v57  ;;  %v1213_v26 = vpop.f32.mrf.mxu0  ;;  %v1325_v56 = vpop.f32.mrf.mxu1 }
 0x26a   :  { %v1214_v3 = vadd.f32 %v1213_v26, %v2208_v8 }
 0x26b   :  { %v1504_v46 = vadd.f32 %v1503_v1, %v1421_v6  ;;  %v1507_v17 = vpop.f32.mrf.mxu3 }
 0x26c   :  { %v1320_v48 = vadd.f32 %v1319_v2, %v1214_v3 }
 0x26d   :  { %v1618_v12 = vmul.f32 %v1504_v46, %v2191_v53 }
 0x26f   :  { %v1633_v19 = vadd.f32 %v1632_v43, %v1618_v12 }
 0x270   :  { %v1424_v0 = vpop.f32.mrf.mxu2 }
 0x271   :  { %v1425_v58 = vadd.f32 %v1424_v0, %v1320_v48  ;;  %v1218_v32 = vpop.f32.mrf.mxu0  ;;  %v1331_v42 = vpop.f32.mrf.mxu1 }
 0x272   :  { %v1219_v15 = vadd.f32 %v1218_v32, %v2218_v34 }
 0x273   :  { %v1508_v36 = vadd.f32 %v1507_v17, %v1425_v58  ;;  %v1511_v5 = vpop.f32.mrf.mxu3 }
 0x274   :  { %v1326_v22 = vadd.f32 %v1325_v56, %v1219_v15 }
 0x275   :  { %v1619_v27 = vmul.f32 %v1508_v36, %v2201_v14 }
 0x277   :  { %v1634_v11 = vadd.f32 %v1633_v19, %v1619_v27 }
 0x278   :  { %v1428_v31 = vpop.f32.mrf.mxu2 }
 0x279   :  { %v1429_v40 = vadd.f32 %v1428_v31, %v1326_v22  ;;  %v1223_v8 = vpop.f32.mrf.mxu0  ;;  %v1337_v55 = vpop.f32.mrf.mxu1 }
 0x27a   :  { %v1224_v53 = vadd.f32 %v1223_v8, %v2228_v30 }
 0x27b   :  { %v1512_v7 = vadd.f32 %v1511_v5, %v1429_v40  ;;  %v1515_v60 = vpop.f32.mrf.mxu3 }
 0x27c   :  { %v1332_v23 = vadd.f32 %v1331_v42, %v1224_v53 }
 0x27d   :  { %v1620_v35 = vmul.f32 %v1512_v7, %v2211_v38 }
 0x27f   :  { %v1635_v45 = vadd.f32 %v1634_v11, %v1620_v35 }
 0x280   :  { %v1432_v16 = vpop.f32.mrf.mxu2 }
 0x281   :  { %v1433_v21 = vadd.f32 %v1432_v16, %v1332_v23  ;;  %v1228_v34 = vpop.f32.mrf.mxu0  ;;  %v1343_v63 = vpop.f32.mrf.mxu1 }
 0x282   :  { %v1229_v14 = vadd.f32 %v1228_v34, %v2238_v25 }
 0x283   :  { %v1516_v20 = vadd.f32 %v1515_v60, %v1433_v21  ;;  %v1519_v44 = vpop.f32.mrf.mxu3 }
 0x284   :  { %v1338_v29 = vadd.f32 %v1337_v55, %v1229_v14 }
 0x285   :  { %v1621_v28 = vmul.f32 %v1516_v20, %v2221_v54 }
 0x287   :  { %v1636_v9 = vadd.f32 %v1635_v45, %v1621_v28 }
 0x288   :  { %v1436_v2 = vpop.f32.mrf.mxu2 }
 0x289   :  { %v1437_v33 = vadd.f32 %v1436_v2, %v1338_v29  ;;  %v1233_v30 = vpop.f32.mrf.mxu0  ;;  %v1349_v43 = vpop.f32.mrf.mxu1 }
 0x28a   :  { %v1234_v38 = vadd.f32 %v1233_v30, %v2248_v41 }
 0x28b   :  { %v1520_v52 = vadd.f32 %v1519_v44, %v1437_v33  ;;  %v1523_v1 = vpop.f32.mrf.mxu3 }
 0x28c   :  { %v1344_v39 = vadd.f32 %v1343_v63, %v1234_v38 }
 0x28d   :  { %v1622_v13 = vmul.f32 %v1520_v52, %v2231_v18 }
 0x28f   :  { %v1637_v57 = vadd.f32 %v1636_v9, %v1622_v13 }
 0x290   :  { %v1440_v6 = vpop.f32.mrf.mxu2 }
 0x291   :  { %v1441_v25 = vadd.f32 %v1440_v6, %v1344_v39  ;;  %v1238_v26 = vpop.f32.mrf.mxu0  ;;  %v1355_v19 = vpop.f32.mrf.mxu1 }
 0x292   :  { %v1239_v54 = vadd.f32 %v1238_v26, %v2258_v10 }
 0x293   :  { %v1524_v56 = vadd.f32 %v1523_v1, %v1441_v25  ;;  %v1527_v46 = vpop.f32.mrf.mxu3 }
 0x294   :  { %v1350_v12 = vadd.f32 %v1349_v43, %v1239_v54 }
 0x295   :  { %v1623_v3 = vmul.f32 %v1524_v56, %v2241_v47 }
 0x297   :  { %v1638_v17 = vadd.f32 %v1637_v57, %v1623_v3 }
 0x298   :  { %v1444_v48 = vpop.f32.mrf.mxu2 }
 0x299   :  { %v1445_v41 = vadd.f32 %v1444_v48, %v1350_v12  ;;  %v1243_v0 = vpop.f32.mrf.mxu0  ;;  %v1361_v11 = vpop.f32.mrf.mxu1 }
 0x29a   :  { %v1244_v18 = vadd.f32 %v1243_v0, %v2268_v4 }
 0x29b   :  { %v1528_v58 = vadd.f32 %v1527_v46, %v1445_v41  ;;  %v1531_v32 = vpop.f32.mrf.mxu3 }
 0x29c   :  { %v1356_v15 = vadd.f32 %v1355_v19, %v1244_v18 }
 0x29d   :  { %v1624_v42 = vmul.f32 %v1528_v58, %v2251_v37 }
 0x29f   :  { %v1639_v36 = vadd.f32 %v1638_v17, %v1624_v42 }
 0x2a0   :  { %v1448_v5 = vpop.f32.mrf.mxu2 }
 0x2a1   :  { %v1449_v27 = vadd.f32 %v1448_v5, %v1356_v15  ;;  %v1248_v10 = vpop.f32.mrf.mxu0  ;;  %v1367_v35 = vpop.f32.mrf.mxu1 }
 0x2a2   :  { %v1249_v47 = vadd.f32 %v1248_v10, %v2278_v24 }
 0x2a3   :  { %v1532_v22 = vadd.f32 %v1531_v32, %v1449_v27  ;;  %v1535_v40 = vpop.f32.mrf.mxu3 }
 0x2a4   :  { %v1362_v8 = vadd.f32 %v1361_v11, %v1249_v47 }
 0x2a5   :  { %v1625_v31 = vmul.f32 %v1532_v22, %v2261_v62 }
 0x2a7   :  { %v1640_v55 = vadd.f32 %v1639_v36, %v1625_v31 }
 0x2a8   :  { %v1452_v7 = vpop.f32.mrf.mxu2 }
 0x2a9   :  { %v1453_v53 = vadd.f32 %v1452_v7, %v1362_v8  ;;  %v1253_v4 = vpop.f32.mrf.mxu0  ;;  %v1373_v63 = vpop.f32.mrf.mxu1 }
 0x2aa   :  { %v1254_v37 = vadd.f32 %v1253_v4, %v2288_v61 }
 0x2ab   :  { %v1536_v60 = vadd.f32 %v1535_v40, %v1453_v53  ;;  %v1539_v21 = vpop.f32.mrf.mxu3 }
 0x2ac   :  { %v1368_v23 = vadd.f32 %v1367_v35, %v1254_v37 }
 0x2ad   :  { %v1626_v45 = vmul.f32 %v1536_v60, %v2271_v50 }
 0x2af   :  { %v1641_v16 = vadd.f32 %v1640_v55, %v1626_v45 }
 0x2b0   :  { %v1456_v34 = vpop.f32.mrf.mxu2 }
 0x2b1   :  { %v1457_v20 = vadd.f32 %v1456_v34, %v1368_v23  ;;  %v1258_v24 = vpop.f32.mrf.mxu0 }
 0x2b2   :  { %v1259_v62 = vadd.f32 %v1258_v24, %v2295_v49 }
 0x2b3   :  { %v1540_v14 = vadd.f32 %v1539_v21, %v1457_v20  ;;  %v1543_v61 = vpop.f32.mrf.mxu3 }
 0x2b4   :  { %v1374_v28 = vadd.f32 %v1373_v63, %v1259_v62 }
 0x2b5   :  { %v1627_v44 = vmul.f32 %v1540_v14, %v2281_v59 }
 0x2b7   :  { %v1642_v9 = vadd.f32 %v1641_v16, %v1627_v44 }
 0x2b8   :  { %v1460_v29 = vpop.f32.mrf.mxu2 }
 0x2b9   :  { %v1461_v2 = vadd.f32 %v1460_v29, %v1374_v28 }
 0x2bb   :  { %v1544_v33 = vadd.f32 %v1543_v61, %v1461_v2 }
 0x2bd   :  { %v1628_v50 = vmul.f32 %v1544_v33, %v2291_v51 }
 0x2bf   :  { %v1643_v30 = vadd.f32 %v1642_v9, %v1628_v50 }
 0x2c1   :  { %1644 = vadd.xlane.f32.xlu1 %v1643_v30 }
 0x334   :  { %v1645_v52 = vpop.xlane.xlu1 %1644 }
 0x335   :  { %v1646_v38 = vrot.slane %v1645_v52, 4 }
 0x337   :  { %v1647_v1 = vadd.f32 %v1646_v38, %v1645_v52 }
 0x339   :  { %v1648_v13 = vrot.slane %v1647_v1, 2 }
 0x33b   :  { %v1649_v43 = vadd.f32 %v1648_v13, %v1647_v1 }
 0x33d   :  { %v1650_v57 = vrot.slane %v1649_v43, 1 }
 0x33f   :  { %v1651_v49 = vadd.f32 %v1650_v57, %v1649_v43 }
 0x341   :  { %1689 = vpush %v1651_v49 }
 0x372   :  { %s1690_s0 = spop %1689 }
 0x373   :  { %v1653_v59 = vstv %s1690_s0 }
 0x374   :  { %1699 = vrsqrt.f32 %v1653_v59  ;;  %vm1661_vm2 = vcmp.eq.f32.partialorder %v1653_v59, inf  ;;  %v1664_v46 = vand.u32 2147483648, %v1653_v59  ;;  %vm1663_vm3 = vcmp.eq.f32.partialorder %v1653_v59, 0.0 }
 0x37a   :  { %v1700_v39 = vpop.eup %1699 }
 0x37b   :  { %v1655_v6 = vmul.f32 %v1700_v39, %v1653_v59 }
 0x37d   :  { %v1656_v25 = vmul.f32 %v1700_v39, %v1655_v6 }
 0x37f   :  { %v1657_v26 = vmul.f32 0.5, %v1656_v25 }
 0x381   :  { %v1658_v56 = vsub.f32 1.5, %v1657_v26 }
 0x383   :  { %v1659_v54 = vmul.f32 %v1700_v39, %v1658_v56 }
 0x385   :  { %v1660_v51 = vmul.f32 %v1659_v54, %v1653_v59 }
 0x387   :  { %v1662_v3 = vsel %vm1661_vm2, %v1653_v59, %v1660_v51 }
 0x388   :  { %v1665_v17 = vsel %vm1663_vm3, %v1664_v46, %v1662_v3 }
 0x389   :  { %1691 = vpush %v1665_v17 }
 0x3ba   :  { %s1692_s25 = spop %1691 }
 0x3bb   :  { %v1667_v12 = vstv %s1692_s25 }
 0x3bc   :  { %v1668_v19 = vmul.f32 0.0078125, %v1667_v12 }
 0x3be   :  { %1670 = vst.msk [vmem:[#allocation9] sm:$0x1] %vm1669_vm4, %v1668_v19 }
 0x3bf   :  { %1681 = dma.vmem_to_hbm [thread:$0]  %s1677_s21, 16, %s1679_s24, [#allocation6]  }
 0x3c0   :  { %1777 = dma.done.wait [#allocation6], 16  }
 0x3c1   :  { %1778 = vsyncadd [#allocation6], 4294967280 }
 0x3c2   :  { %1686 = vsyncpa [#allocation5], 1 }
 0x3c3   :  { %1687 = vsyncpa [#allocation8], 1 }
 0x3c4   :  { %1688 = vsyncpa [#allocation6], 1 }

</bundles_post_ra>
